<compile_context>
chip_gen: v6e
topology: v6e:2x2x1
jax: 0.10.0
libtpu: 0.0.40
codegen_flags: <defaults>
</compile_context>

<pallas_src>
import functools

import jax
import jax.numpy as jnp
from jax.experimental import pallas as pl
from jax.experimental.pallas import tpu as pltpu

LANE = 128


def _round_up(n: int, m: int) -> int:
    return ((n + m - 1) // m) * m


def _ffnn_kernel(*refs, n_stacked):
    """Fused MLP forward for one batch tile.

    refs = (x, w0, b0, [w_stack, b_stack,] w_out, b_out, o)
    Hidden layers: relu(h @ w + b); output layer: h @ w + b (no activation).
    x / weights are bf16; matmuls accumulate in f32 on the MXU; bias/ReLU f32.
    """
    o_ref = refs[-1]
    x_ref, w0_ref, b0_ref = refs[0], refs[1], refs[2]
    if n_stacked > 0:
        wstk_ref, bstk_ref = refs[3], refs[4]
        wout_ref, bout_ref = refs[5], refs[6]
    else:
        wout_ref, bout_ref = refs[3], refs[4]

    # First hidden layer: (TM, F) @ (F, H) -> f32 (TM, H)
    h = jnp.dot(x_ref[...], w0_ref[...], preferred_element_type=jnp.float32)
    h = jnp.maximum(h + b0_ref[...], 0.0)

    # Remaining hidden layers (unrolled at trace time).
    for i in range(n_stacked):
        h = jnp.dot(h.astype(jnp.bfloat16), wstk_ref[i],
                    preferred_element_type=jnp.float32)
        h = jnp.maximum(h + bstk_ref[i], 0.0)

    # Output layer (no activation).
    y = jnp.dot(h.astype(jnp.bfloat16), wout_ref[...],
                preferred_element_type=jnp.float32) + bout_ref[...]
    o_ref[...] = y.astype(o_ref.dtype)


def _physical_vmem_bytes() -> int:
    try:
        return int(pltpu.get_tpu_info().vmem_capacity_bytes)
    except Exception:
        return 64 << 20  # conservative (v7x per-TC)


def ffnn_forward(x, weights, biases, *, block_m=256, out_dtype=jnp.float32):
    """weights[i]: (in_i, out_i) f32; biases[i]: (1, out_i) f32. Last pair = output layer."""
    B, F = x.shape
    H = weights[0].shape[1]
    C = weights[-1].shape[1]
    L = len(weights) - 1           # number of hidden layers
    n_stacked = L - 1              # hidden-to-hidden layers

    # Pad lane dims to 128; batch tile is a multiple of 16 (bf16 sublane packing).
    # NOTE: K stays at 128 for small models (don't zero-pad contraction depth to
    # "fill" the 256-deep MXU on v6e/v7x - utilization comes from a larger tm).
    F_pad = _round_up(F, LANE)
    H_pad = _round_up(H, LANE)
    C_pad = _round_up(C, LANE)
    # Larger tiles amortize the ~0.35us per-grid-step overhead; keep at least a
    # few grid steps when the batch is large so pipelining / the v7x megacore
    # split still overlap DMA with compute.
    tm = min(_round_up(block_m, 16), _round_up(B, 16))
    B_pad = _round_up(B, tm)

    f32, bf16 = jnp.float32, jnp.bfloat16

    def pad2(a, r, c):
        return jnp.pad(a, ((0, r - a.shape[0]), (0, c - a.shape[1])))

    # x is the only operand streamed every grid step -> stream it in bf16.
    x_p = pad2(x.astype(f32), B_pad, F_pad).astype(bf16)
    w0 = pad2(weights[0], F_pad, H_pad).astype(bf16)
    b0 = pad2(biases[0].reshape(1, -1), 1, H_pad).astype(f32)
    w_out = pad2(weights[-1], H_pad, C_pad).astype(bf16)
    b_out = pad2(biases[-1].reshape(1, -1), 1, C_pad).astype(f32)

    # Grid-invariant operands: constant index_map + single buffer (Buffered(1)).
    resident = functools.partial(pl.BlockSpec, pipeline_mode=pl.Buffered(1))

    operands = [x_p, w0, b0]
    in_specs = [
        pl.BlockSpec((tm, F_pad), lambda i: (i, 0)),        # batch-tiled activations
        resident((F_pad, H_pad), lambda i: (0, 0)),         # weights stay VMEM-resident
        resident((1, H_pad), lambda i: (0, 0)),
    ]

    if n_stacked > 0:
        # TODO(synk): for very large hidden_size on v7x (64 MiB VMEM), stream
        # w_stk one layer at a time (memory_space=pl.ANY + make_async_copy)
        # instead of keeping the whole (L-1, H, H) stack resident.
        w_stk = jnp.stack([pad2(w, H_pad, H_pad) for w in weights[1:L]]).astype(bf16)
        b_stk = jnp.stack(
            [pad2(b.reshape(1, -1), 1, H_pad) for b in biases[1:L]]).astype(f32)
        operands += [w_stk, b_stk]
        in_specs += [
            resident((n_stacked, H_pad, H_pad), lambda i: (0, 0, 0)),
            resident((n_stacked, 1, H_pad), lambda i: (0, 0, 0)),
        ]

    operands += [w_out, b_out]
    in_specs += [
        resident((H_pad, C_pad), lambda i: (0, 0)),
        resident((1, C_pad), lambda i: (0, 0)),
    ]

    # --- VMEM budget: resident weights (x1) + streamed x/out (x2) + live acts.
    out_bytes = jnp.dtype(out_dtype).itemsize
    resident_bytes = 2 * (F_pad * H_pad + n_stacked * H_pad * H_pad + H_pad * C_pad)
    resident_bytes += 4 * 8 * (H_pad * (1 + n_stacked) + C_pad)   # biases, sublane-padded
    streamed_bytes = 2 * tm * F_pad * 2 + 2 * tm * C_pad * out_bytes
    live_bytes = 2 * tm * max(F_pad, H_pad, C_pad) * 4            # f32 working activations
    vmem_limit = int((resident_bytes + streamed_bytes + live_bytes) * 1.25) + (4 << 20)
    vmem_limit = max(32 << 20, min(vmem_limit, int(_physical_vmem_bytes() * 0.85)))

    kernel = functools.partial(_ffnn_kernel, n_stacked=n_stacked)

    out = pl.pallas_call(
        kernel,
        out_shape=jax.ShapeDtypeStruct((B_pad, C_pad), out_dtype),
        grid=(B_pad // tm,),
        in_specs=in_specs,
        out_specs=pl.BlockSpec((tm, C_pad), lambda i: (i, 0)),
        compiler_params=pltpu.CompilerParams(
            # Batch tiles are independent -> shard across the 2 TCs on v7x.
            dimension_semantics=("parallel",),
            vmem_limit_bytes=vmem_limit,
        ),
    )(*operands)

    return out[:B, :C]


def init_params(key, n_features, hidden_size, layers, n_classes):
    """Deterministic init mimicking PyTorch nn.Linear (uniform +/- 1/sqrt(fan_in)).

    Returns weights as (in, out) and biases as (1, out), all f32.
    """
    dims = [n_features] + [hidden_size] * layers + [n_classes]
    weights, biases = [], []
    for i in range(len(dims) - 1):
        fan_in, fan_out = dims[i], dims[i + 1]
        key, kw, kb = jax.random.split(key, 3)
        bound = 1.0 / jnp.sqrt(jnp.float32(fan_in))
        w = jax.random.uniform(kw, (fan_in, fan_out), jnp.float32, -bound, bound)
        b = jax.random.uniform(kb, (1, fan_out), jnp.float32, -bound, bound)
        weights.append(w)
        biases.append(b)
    return weights, biases


def reference_forward(x, weights, biases):
    h = x
    for w, b in zip(weights[:-1], biases[:-1]):
        h = jnp.maximum(h @ w + b, 0.0)
    return h @ weights[-1] + biases[-1]


if __name__ == "__main__":
    # Config consistent with the module: 2 classes, 32 features, hidden_size=32,
    # 3 hidden layers. Batch=1024 with tm=256 -> 4 grid steps, so the batch axis
    # both pipelines and shards across TensorCores.
    n_classes, n_features, hidden_size, layers = 2, 32, 32, 3
    batch = 1024

    key = jax.random.PRNGKey(0)
    key, kx = jax.random.split(key)
    x = jax.random.normal(kx, (batch, n_features), jnp.float32)

    weights, biases = init_params(key, n_features, hidden_size, layers, n_classes)

    out = jax.block_until_ready(ffnn_forward(x, weights, biases))
    ref = reference_forward(x, weights, biases)

    assert out.shape == (batch, n_classes)
    # bf16 inputs/weights with f32 accumulation: ~1e-2 relative error vs f32 ref.
    max_err = float(jnp.max(jnp.abs(out - ref)))
    assert jnp.allclose(out, ref, atol=3e-2, rtol=3e-2), f"mismatch, max|err|={max_err}"

    print("KERNEL_OK")
</pallas_src>

<mosaic_0001>
module attributes {stable_mosaic.version = 11 : i64} {
  func.func @_ffnn_kernel(%arg0: i32, %arg1: memref<256x128xbf16, #tpu.memory_space<vmem>>, %arg2: memref<128x128xbf16, #tpu.memory_space<vmem>>, %arg3: memref<1x128xf32, #tpu.memory_space<vmem>>, %arg4: memref<2x128x128xbf16, #tpu.memory_space<vmem>>, %arg5: memref<2x1x128xf32, #tpu.memory_space<vmem>>, %arg6: memref<128x128xbf16, #tpu.memory_space<vmem>>, %arg7: memref<1x128xf32, #tpu.memory_space<vmem>>, %arg8: memref<256x128xf32, #tpu.memory_space<vmem>>) attributes {dimension_semantics = [#tpu.dimension_semantics<parallel>], iteration_bounds = array<i64: 4>, scalar_prefetch = 0 : i64, scratch_operands = 0 : i64, tpu.core_type = #tpu.core_type<tc>, window_params = [{transform_indices = @transform_0, window_bounds = array<i64: 256, 128>}, {pipeline_mode = #tpu.pipeline_mode<synchronous>, transform_indices = @transform_1, window_bounds = array<i64: 128, 128>}, {pipeline_mode = #tpu.pipeline_mode<synchronous>, transform_indices = @transform_2, window_bounds = array<i64: 1, 128>}, {pipeline_mode = #tpu.pipeline_mode<synchronous>, transform_indices = @transform_3, window_bounds = array<i64: 2, 128, 128>}, {pipeline_mode = #tpu.pipeline_mode<synchronous>, transform_indices = @transform_4, window_bounds = array<i64: 2, 1, 128>}, {pipeline_mode = #tpu.pipeline_mode<synchronous>, transform_indices = @transform_5, window_bounds = array<i64: 128, 128>}, {pipeline_mode = #tpu.pipeline_mode<synchronous>, transform_indices = @transform_6, window_bounds = array<i64: 1, 128>}, {transform_indices = @transform_7, window_bounds = array<i64: 256, 128>}]} {
    %c0 = arith.constant 0 : index
    %c0_0 = arith.constant 0 : index
    %0 = vector.load %arg1[%c0, %c0_0] : memref<256x128xbf16, #tpu.memory_space<vmem>>, vector<256x128xbf16>
    %c0_1 = arith.constant 0 : index
    %c0_2 = arith.constant 0 : index
    %1 = vector.load %arg2[%c0_1, %c0_2] : memref<128x128xbf16, #tpu.memory_space<vmem>>, vector<128x128xbf16>
    %cst = arith.constant dense<0.000000e+00> : vector<256x128xf32>
    %2 = tpu.matmul %0, %1, %cst {dimension_numbers = #tpu.dot_dimension_numbers<[1], [0], [0], [1], [0, 0, 1, 1], [], []>} : vector<256x128xbf16>, vector<128x128xbf16>, vector<256x128xf32> -> vector<256x128xf32>
    %c0_3 = arith.constant 0 : index
    %c0_4 = arith.constant 0 : index
    %3 = vector.load %arg3[%c0_3, %c0_4] : memref<1x128xf32, #tpu.memory_space<vmem>>, vector<1x128xf32>
    %4 = vector.broadcast %3 : vector<1x128xf32> to vector<256x128xf32>
    %5 = arith.addf %2, %4 : vector<256x128xf32>
    %cst_5 = arith.constant 0.000000e+00 : f32
    %6 = vector.broadcast %cst_5 : f32 to vector<256x128xf32>
    %7 = arith.maximumf %5, %6 : vector<256x128xf32>
    %8 = arith.truncf %7 : vector<256x128xf32> to vector<256x128xbf16>
    %c0_6 = arith.constant 0 : index
    %c0_7 = arith.constant 0 : index
    %c0_8 = arith.constant 0 : index
    %9 = vector.load %arg4[%c0_6, %c0_7, %c0_8] : memref<2x128x128xbf16, #tpu.memory_space<vmem>>, vector<1x128x128xbf16>
    %10 = vector.shape_cast %9 : vector<1x128x128xbf16> to vector<128x128xbf16>
    %cst_9 = arith.constant dense<0.000000e+00> : vector<256x128xf32>
    %11 = tpu.matmul %8, %10, %cst_9 {dimension_numbers = #tpu.dot_dimension_numbers<[1], [0], [0], [1], [0, 0, 1, 1], [], []>} : vector<256x128xbf16>, vector<128x128xbf16>, vector<256x128xf32> -> vector<256x128xf32>
    %c0_10 = arith.constant 0 : index
    %c0_11 = arith.constant 0 : index
    %c0_12 = arith.constant 0 : index
    %12 = vector.load %arg5[%c0_10, %c0_11, %c0_12] : memref<2x1x128xf32, #tpu.memory_space<vmem>>, vector<1x1x128xf32>
    %13 = vector.shape_cast %12 : vector<1x1x128xf32> to vector<1x128xf32>
    %14 = vector.broadcast %13 : vector<1x128xf32> to vector<256x128xf32>
    %15 = arith.addf %11, %14 : vector<256x128xf32>
    %cst_13 = arith.constant 0.000000e+00 : f32
    %16 = vector.broadcast %cst_13 : f32 to vector<256x128xf32>
    %17 = arith.maximumf %15, %16 : vector<256x128xf32>
    %18 = arith.truncf %17 : vector<256x128xf32> to vector<256x128xbf16>
    %c1 = arith.constant 1 : index
    %c0_14 = arith.constant 0 : index
    %c0_15 = arith.constant 0 : index
    %19 = vector.load %arg4[%c1, %c0_14, %c0_15] : memref<2x128x128xbf16, #tpu.memory_space<vmem>>, vector<1x128x128xbf16>
    %20 = vector.shape_cast %19 : vector<1x128x128xbf16> to vector<128x128xbf16>
    %cst_16 = arith.constant dense<0.000000e+00> : vector<256x128xf32>
    %21 = tpu.matmul %18, %20, %cst_16 {dimension_numbers = #tpu.dot_dimension_numbers<[1], [0], [0], [1], [0, 0, 1, 1], [], []>} : vector<256x128xbf16>, vector<128x128xbf16>, vector<256x128xf32> -> vector<256x128xf32>
    %c1_17 = arith.constant 1 : index
    %c0_18 = arith.constant 0 : index
    %c0_19 = arith.constant 0 : index
    %22 = vector.load %arg5[%c1_17, %c0_18, %c0_19] : memref<2x1x128xf32, #tpu.memory_space<vmem>>, vector<1x1x128xf32>
    %23 = vector.shape_cast %22 : vector<1x1x128xf32> to vector<1x128xf32>
    %24 = vector.broadcast %23 : vector<1x128xf32> to vector<256x128xf32>
    %25 = arith.addf %21, %24 : vector<256x128xf32>
    %cst_20 = arith.constant 0.000000e+00 : f32
    %26 = vector.broadcast %cst_20 : f32 to vector<256x128xf32>
    %27 = arith.maximumf %25, %26 : vector<256x128xf32>
    %28 = arith.truncf %27 : vector<256x128xf32> to vector<256x128xbf16>
    %c0_21 = arith.constant 0 : index
    %c0_22 = arith.constant 0 : index
    %29 = vector.load %arg6[%c0_21, %c0_22] : memref<128x128xbf16, #tpu.memory_space<vmem>>, vector<128x128xbf16>
    %cst_23 = arith.constant dense<0.000000e+00> : vector<256x128xf32>
    %30 = tpu.matmul %28, %29, %cst_23 {dimension_numbers = #tpu.dot_dimension_numbers<[1], [0], [0], [1], [0, 0, 1, 1], [], []>} : vector<256x128xbf16>, vector<128x128xbf16>, vector<256x128xf32> -> vector<256x128xf32>
    %c0_24 = arith.constant 0 : index
    %c0_25 = arith.constant 0 : index
    %31 = vector.load %arg7[%c0_24, %c0_25] : memref<1x128xf32, #tpu.memory_space<vmem>>, vector<1x128xf32>
    %32 = vector.broadcast %31 : vector<1x128xf32> to vector<256x128xf32>
    %33 = arith.addf %30, %32 : vector<256x128xf32>
    %c0_26 = arith.constant 0 : index
    %c0_27 = arith.constant 0 : index
    %34 = vector.load %arg8[%c0_26, %c0_27] : memref<256x128xf32, #tpu.memory_space<vmem>>, vector<256x128xf32>
    tpu.vector_store %arg8[%c0_26, %c0_27], %33 {strides = array<i32>} : memref<256x128xf32, #tpu.memory_space<vmem>>, vector<256x128xf32>,
    return
  }
  func.func @transform_0(%arg0: i32) -> (i32, i32) {
    %c0_i32 = arith.constant 0 : i32
    %c0_i32_0 = arith.constant 0 : i32
    return %arg0, %c0_i32 : i32, i32
  }
  func.func @transform_1(%arg0: i32) -> (i32, i32) {
    %c0_i32 = arith.constant 0 : i32
    %c0_i32_0 = arith.constant 0 : i32
    %c0_i32_1 = arith.constant 0 : i32
    return %c0_i32, %c0_i32_0 : i32, i32
  }
  func.func @transform_2(%arg0: i32) -> (i32, i32) {
    %c0_i32 = arith.constant 0 : i32
    %c0_i32_0 = arith.constant 0 : i32
    %c0_i32_1 = arith.constant 0 : i32
    return %c0_i32, %c0_i32_0 : i32, i32
  }
  func.func @transform_3(%arg0: i32) -> (i32, i32, i32) {
    %c0_i32 = arith.constant 0 : i32
    %c0_i32_0 = arith.constant 0 : i32
    %c0_i32_1 = arith.constant 0 : i32
    %c0_i32_2 = arith.constant 0 : i32
    return %c0_i32, %c0_i32_0, %c0_i32_1 : i32, i32, i32
  }
  func.func @transform_4(%arg0: i32) -> (i32, i32, i32) {
    %c0_i32 = arith.constant 0 : i32
    %c0_i32_0 = arith.constant 0 : i32
    %c0_i32_1 = arith.constant 0 : i32
    %c0_i32_2 = arith.constant 0 : i32
    return %c0_i32, %c0_i32_0, %c0_i32_1 : i32, i32, i32
  }
  func.func @transform_5(%arg0: i32) -> (i32, i32) {
    %c0_i32 = arith.constant 0 : i32
    %c0_i32_0 = arith.constant 0 : i32
    %c0_i32_1 = arith.constant 0 : i32
    return %c0_i32, %c0_i32_0 : i32, i32
  }
  func.func @transform_6(%arg0: i32) -> (i32, i32) {
    %c0_i32 = arith.constant 0 : i32
    %c0_i32_0 = arith.constant 0 : i32
    %c0_i32_1 = arith.constant 0 : i32
    return %c0_i32, %c0_i32_0 : i32, i32
  }
  func.func @transform_7(%arg0: i32) -> (i32, i32) {
    %c0_i32 = arith.constant 0 : i32
    %c0_i32_0 = arith.constant 0 : i32
    return %arg0, %c0_i32 : i32, i32
  }
}

</mosaic_0001>

<bundles_post_ra>
// kernel: tpu_custom_call.1
= control target key start
LH: loop header
LB: loop body
LE: loop exit
PB: predicated region body
PF: predicated region fallthrough
CT: control target
= control target key end

     0   :  { %s2827_s0 = inlined_call_operand.hbm [shape: bf16[1024,128], index: 0, kind: input, shape index: {}]   ;;  %s2828_s1 = inlined_call_operand.hbm [shape: bf16[128,128], index: 1, kind: input, shape index: {}]   ;;  %s2829_s2 = inlined_call_operand.vmem [shape: f32[1,128], index: 2, kind: input, shape index: {}]   ;;  %s2830_s3 = inlined_call_operand.hbm [shape: bf16[2,128,128], index: 3, kind: input, shape index: {}]   ;;  %s2831_s4 = inlined_call_operand.vmem [shape: f32[2,1,128], index: 4, kind: input, shape index: {}]   ;;  %s2832_s5 = inlined_call_operand.hbm [shape: bf16[128,128], index: 5, kind: input, shape index: {}]   ;;  %s2833_s6 = inlined_call_operand.vmem [shape: f32[1,128], index: 6, kind: input, shape index: {}]   ;;  %s2834_s7 = inlined_call_operand.hbm [shape: f32[1024,128], index: 7, kind: output, shape index: {}]  }
   0x1   :  { %2841 = sst [smem:[#allocation15_spill]] %s2828_s1 }
   0x2   :  { %12 = vsyncpa [#allocation3], 0 }
   0x3   :  { %14 = vsyncpa [#allocation3 + $0x1], 0 }
   0x4   :  { %15 = vsyncpa [#allocation6], 0 }
   0x5   :  { %16 = vsyncpa [#allocation9], 0 }
   0x6   :  { %17 = vsyncpa [#allocation4], 0 }
   0x7   :  { %19 = vsyncpa [#allocation4 + $0x1], 0  ;;  %s2415_s24 = smov 0   ;;  %s2417_s25 = smov 0  }
   0x8   :  { %s2419_s26 = smov 0   ;;  %s2421_s27 = smov 0  }
   0x9 LB: > { %s2436_s28 = sadd.s32 4294967295, %s2364_s27   ;;  %s1694_s29 = sadd.s32 4294967294, %s2364_s27   ;;  %s2364_s27 = sphi %s2421_s27, %s2862_s27   ;;  %s2360_s26 = sphi %s2419_s26, %s2861_s26   ;;  %s2356_s25 = sphi %s2417_s25, %s2860_s25   ;;  %s2352_s24 = sphi %s2415_s24, %s2859_s24  }
   0xa   : > { %p45_p0 = scmp.ne.s32.totalorder %s2356_s25, %s2352_s24  ;;  %p2835_p1 = scmp.eq.s32.totalorder %s2436_s28, 0 }
   0xb   : > { %p195_p2 = scmp.eq.s32.totalorder %s2436_s28, 3  ;;  %p201_p3 = scmp.eq.s32.totalorder %s1694_s29, 3 }
   0xc   : > { %p2445_p4 = por %p2835_p1, %p45_p0  ;;  %p1695_p5 = scmp.ge.s32.totalorder %s2364_s27, 1 }
   0xd   : > { %p2450_p6 = por %p201_p3, %p45_p0  ;;  %p208_p7 = scmp.lt.s32.totalorder %s2364_s27, 5 }
   0xe   : > { %s2842_s30 = scalar_select %p2445_p4, 1, 0 }
   0xf   : > { %s2843_s8 = scalar_select %p2450_p6, 1, 0 }
  0x10   : > { %p2455_p8 = pnand %p1695_p5, %p208_p7  ;;  %s2366_s10 = smov [#allocation5]  }
  0x11   : > { %s220_s11 = sshll.u32 %s2366_s10, 4  ;;  %s2367_s13 = smov [#allocation7]   ;;  %s221_s11 = int_to_ptr.vmem [resolvable:$true] %s220_s11 }
  0x12   : > { %s2844_s9 = scalar_select %p2455_p8, 1, 0 }
  0x13   : > { %p2073_p9 = pneg %p2455_p8  ;;  %s236_s14 = sshll.u32 %s2367_s13, 4  ;;  %s237_s14 = int_to_ptr.vmem [resolvable:$true] %s236_s14 }
  0x14   : > { %s2368_s15 = smov [#allocation8]   ;;  %s2197_s17 = scalar_lea.vmem %s221_s11, 1024 }
  0x15   : > { %p2463_p10 = pnand %p2073_p9, %p2835_p1  ;;  %s252_s16 = sshll.u32 %s2368_s15, 4  ;;  %s253_s16 = int_to_ptr.vmem [resolvable:$true] %s252_s16 }
  0x16   : > { %p2198_p12 = scmp.ne.s32.totalorder %s221_s11, %s2197_s17  ;;  %p2205_p3 = scmp.lt.s32.totalorder %s221_s11, %s221_s11 }
  0x17   : > { %p2188_p11 = pneg %p2463_p10  ;;  %p2206_p5 = scmp.lt.s32.totalorder %s2197_s17, %s2197_s17 }
  0x19   : > { %p2200_p13 = pnand %p2198_p12, %p2188_p11  ;;  %p2207_p7 = por %p2206_p5, %p2205_p3 }
  0x1b   : > { %p2201_p0 = pneg %p2200_p13 }
  0x1d   : > { %p2208_p9 = pnand %p2207_p7, %p2201_p0 }
  0x1f   : > { %2211 = shalt.err (!%p2208_p9)
}
  0x20   : > { %s2836_s18 = smov 64   ;;  %s2837_s19 = smov 4  }
  0x21   : > { %s2846_s1 = sld [smem:[#allocation15_spill]]  ;;  %s2223_s22 = scalar_lea.vmem %s237_s14, 2048 }
  0x22   : > { %p2224_p12 = scmp.ne.s32.totalorder %s237_s14, %s2223_s22  ;;  %p2231_p0 = scmp.lt.s32.totalorder %s237_s14, %s237_s14 }
  0x23   : > { %p2232_p5 = scmp.lt.s32.totalorder %s2223_s22, %s2223_s22 }
  0x24   : > { %p2226_p13 = pnand %p2224_p12, %p2188_p11 }
  0x25   : > { %p2233_p7 = por %p2232_p5, %p2231_p0 }
  0x26   : > { %p2227_p3 = pneg %p2226_p13 }
  0x27   : > { %2076 = dma.hbm_to_vmem [thread:$0]  (!%p2463_p10), %s2846_s1, 1024, %s221_s11, [#allocation6], %s2836_s18, %s2836_s18, %s2837_s19  }
  0x28   : > { %p2234_p9 = pnand %p2233_p7, %p2227_p3 }
  0x2a   : > { %2237 = shalt.err (!%p2234_p9)
}
  0x2b   : > { %2079 = dma.hbm_to_vmem [thread:$0]  (!%p2463_p10), %s2830_s3, 2048, %s237_s14, [#allocation6], %s2836_s18, %s2836_s18, %s2837_s19  }
  0x2c   : > { %s2249_s10 = scalar_lea.vmem %s253_s16, 1024  ;;  %p2257_p0 = scmp.lt.s32.totalorder %s253_s16, %s253_s16 }
  0x2d   : > { %p2250_p1 = scmp.ne.s32.totalorder %s253_s16, %s2249_s10  ;;  %p2258_p3 = scmp.lt.s32.totalorder %s2249_s10, %s2249_s10 }
  0x2f   : > { %p2252_p12 = pnand %p2250_p1, %p2188_p11  ;;  %p2259_p5 = por %p2258_p3, %p2257_p0 }
  0x31   : > { %p2253_p13 = pneg %p2252_p12 }
  0x33   : > { %p2260_p7 = pnand %p2259_p5, %p2253_p13 }
  0x35   : > { %2263 = shalt.err (!%p2260_p7)
}
  0x36   : > { %2082 = dma.hbm_to_vmem [thread:$0]  (!%p2463_p10), %s2832_s5, 1024, %s253_s16, [#allocation9], %s2836_s18, %s2836_s18, %s2837_s19  }
  0x37   : > { %s2503_s14 = sadd.s32 1, %s2364_s27   ;;  %s32_s15 = sadd.s32 1, %s2360_s26 }
  0x38   : > { %s29_s12 = ssub.s32 %s2364_s27, %s2503_s14  ;;  %p39_p11 = scmp.ne.s32.totalorder %s2360_s26, %s2356_s25 }
  0x39   : > { %p30_p1 = scmp.eq.s32.totalorder %s29_s12, 0  ;;  %p40_p9 = scmp.eq.s32.totalorder %s2364_s27, 0 }
  0x3a   : > { %p2094_p12 = scmp.lt.s32.totalorder %s2364_s27, 4  ;;  %p2517_p0 = por %p195_p2, %p39_p11 }
  0x3b   : > { %s2513_s17 = scalar_select %p30_p1, %s2360_s26, %s32_s15  }
  0x3c   : > { %p41_p13 = por %p40_p9, %p39_p11  ;;  %s269_s21 = sand.u32 1, %s2360_s26  }
  0x3d   : > { %s2847_s20 = scalar_select %p2517_p0, 1, 0 }
  0x3e   : > { %s1767_s22 = sshll.u32 %s2364_s27, 11  ;;  %s1700_s16 = sshll.u32 %s269_s21, 7 }
  0x3f   : > { %s2526_s10 = scalar_lea.hbm %s2827_s0, %s1767_s22  ;;  %s273_s11 = scalar_lea.vmem [#allocation2], %s1700_s16 }
  0x40   : > { %s280_s13 = sshll.u32 %s273_s11, 4  ;;  %p2528_p10 = pnand %p2094_p12, %p41_p13  ;;  %s2532_s13 = int_to_ptr.vmem [resolvable:$true] %s280_s13 }
  0x41   : > { %s2534_s15 = scalar_lea.sflag [#allocation3], %s269_s21  ;;  %s2264_s18 = scalar_lea.hbm %s2526_s10, 2048 }
  0x42   : > { %p2265_p2 = scmp.ne.s32.totalorder %s2526_s10, %s2264_s18  ;;  %p2266_p3 = pneg %p2528_p10 }
  0x43   : > { %s2269_s16 = scalar_lea.hbm %s2827_s0, 8192  ;;  %p2270_p1 = scmp.lt.s32.totalorder %s2526_s10, %s2827_s0 }
  0x44   : > { %p2267_p5 = pnand %p2266_p3, %p2265_p2  ;;  %p2271_p11 = scmp.lt.s32.totalorder %s2269_s16, %s2264_s18 }
  0x46   : > { %p2268_p7 = pneg %p2267_p5  ;;  %p2272_p9 = por %p2271_p11, %p2270_p1 }
  0x48   : > { %p2273_p12 = pnand %p2272_p9, %p2268_p7 }
  0x4a   : > { %2276 = shalt.err (!%p2273_p12)
}
  0x4b   : > { %s2277_s21 = scalar_lea.vmem %s2532_s13, 2048  ;;  %s2371_s19 = smov [#allocation2]  }
  0x4c   : > { %p2278_p13 = scmp.ne.s32.totalorder %s2532_s13, %s2277_s21  ;;  %s2282_s1 = sshll.u32 %s2371_s19, 4  ;;  %s2283_s1 = int_to_ptr.vmem [resolvable:$false] %s2282_s1 }
  0x4d   : > { %s2284_s22 = scalar_lea.vmem %s2283_s1, 4096  ;;  %p2285_p5 = scmp.lt.s32.totalorder %s2532_s13, %s2283_s1 }
  0x4e   : > { %p2280_p6 = pnand %p2278_p13, %p2266_p3  ;;  %p2286_p0 = scmp.lt.s32.totalorder %s2284_s22, %s2277_s21 }
  0x50   : > { %p2281_p2 = pneg %p2280_p6  ;;  %p2287_p4 = por %p2286_p0, %p2285_p5 }
  0x52   : > { %p2288_p8 = pnand %p2287_p4, %p2281_p2 }
  0x54   : > { %2291 = shalt.err (!%p2288_p8)
}
  0x55   : > { %s2849_s18 = smov 4   ;;  %s2850_s23 = smov 64  }
  0x56   : > { %2086 = dma.hbm_to_vmem [thread:$0]  (!%p2528_p10), %s2526_s10, 2048, %s2532_s13, %s2534_s15, %s2850_s23, %s2850_s23, %s2849_s18  }
  0x57   : > { %p2851_p6 = scmp.ne.s32.totalorder %s2844_s9, 0 }
  0x58   : > { %s2561_s19 = sand.u32 (!%p2851_p6), 1, %s2356_s25   ;;  %p2852_p4 = scmp.ne.s32.totalorder (!%p2851_p6), %s2842_s30, 0 }
  0x59   : > { %292 = sbr.rel (%p2851_p6) target bundleno = 1024 (0x400), region = 48  ;;  %s1704_s1 = sshll.u32 (!%p2851_p6), %s2561_s19, 7 }
  0x5a   : > { %s295_s16 = scalar_lea.sflag (!%p2851_p6), [#allocation3], %s2561_s19  ;;  %s2565_s29 = scalar_lea.vmem (!%p2851_p6), [#allocation2], %s1704_s1 }
  0x5e   : > { %2335 = dma.done.wait (%p2852_p4), %s295_s16, 2048  }
  0x5f   : > { %2337 = vsyncadd (%p2852_p4), %s295_s16, 4294965248  ;;  %p2853_p8 = scmp.eq.s32.totalorder %s2436_s28, 0 }
  0x61   : > { %2339 = dma.done.wait (%p2853_p8), [#allocation6], 3072   ;;  %p2854_p0 = pmov %p2853_p8 }
  0x63   : > { %2341 = vsyncadd (%p2854_p0), [#allocation6], 4294964224  ;;  %p2855_p10 = pmov %p2854_p0 }
  0x64   : > { %p2856_p3 = pmov %p2854_p0 }
  0x65   : > { %2343 = dma.done.wait (%p2855_p10), [#allocation9], 1024  }
  0x66   : > { %2345 = vsyncadd (%p2856_p3), [#allocation9], 4294966272  ;;  %v2138_v0 = vld [vmem:[#allocation5 + $0x38] sm:$0xff]   ;;  %v2139_v1 = vld [vmem:[#allocation5 + $0x30] sm:$0xff]   ;;  %s1708_s11 = sshll.u32 %s2561_s19, 8  ;;  %s1768_s23 = sshll.u32 %s2436_s28, 12 }
  0x67   : > { %1865 = vmatprep.subr.bf16.mxu0 %v2138_v0  ;;  %v2140_v2 = vld [vmem:[#allocation5 + $0x28] sm:$0xff]   ;;  %v2141_v3 = vld [vmem:[#allocation5 + $0x20] sm:$0xff]   ;;  %v2142_v5 = vld [vmem:[#allocation5 + $0x18] sm:$0xff]   ;;  %s2713_s18 = scalar_lea.vmem [#allocation10], %s1708_s11  ;;  %s2780_s30 = scalar_lea.hbm %s2834_s7, %s1768_s23 }
  0x68   : > { %1866 = vmatpush3.bf16.msra.mxu0 %v2138_v0  ;;  %v2146_v4 = vld [vmem:[%s2565_s29] sm:$0xff]   ;;  %v2143_v6 = vld [vmem:[#allocation5 + $0x10] sm:$0xff]   ;;  %v2144_v7 = vld [vmem:[#allocation5 + $0x8] sm:$0xff]   ;;  %s1592_s1 = sshll.u32 %s2713_s18, 4  ;;  %s1579_s28 = scalar_lea.sflag [#allocation4], %s2561_s19  ;;  %s2782_s1 = int_to_ptr.vmem [resolvable:$true] %s1592_s1 }
  0x69   : > { %1867 = vmatprep.subr.bf16.mxu0 %v2139_v1  ;;  %1881 = vmatprep.mubr.bf16.mxu0 %v2146_v4  ;;  %v2145_v8 = vld [vmem:[#allocation5] sm:$0xff]   ;;  %v2162_v9 = vld [vmem:[#allocation7 + $0x38] sm:$0xff]   ;;  %v2163_v10 = vld [vmem:[#allocation7 + $0x30] sm:$0xff]   ;;  %s2292_s9 = scalar_lea.vmem %s2782_s1, 4096  ;;  %p2857_p1 = scmp.ne.s32.totalorder %s2847_s20, 0 }
  0x6a   : > { %1913 = vmatprep.subr.bf16.mxu1 %v2162_v9  ;;  %v2147_v11 = vld [vmem:[%s2565_s29 + $0x8] sm:$0xff]   ;;  %v2148_v13 = vld [vmem:[%s2565_s29 + $0x10] sm:$0xff]   ;;  %v2165_v14 = vld [vmem:[#allocation7 + $0x20] sm:$0xff]   ;;  %p2293_p7 = scmp.ne.s32.totalorder %s2782_s1, %s2292_s9  ;;  %s2372_s10 = smov [#allocation10]  }
  0x6b   : > { %1914 = vmatpush3.bf16.msra.mxu1 %v2162_v9  ;;  %v2164_v12 = vld [vmem:[#allocation7 + $0x28] sm:$0xff]   ;;  %v2166_v15 = vld [vmem:[#allocation7 + $0x18] sm:$0xff]   ;;  %v2150_v17 = vld [vmem:[%s2565_s29 + $0x20] sm:$0xff]   ;;  %s2296_s13 = sshll.u32 %s2372_s10, 4  ;;  %s2297_s13 = int_to_ptr.vmem [resolvable:$false] %s2296_s13 }
  0x6c   : > { %1868 = vmatpush3.bf16.msra.mxu0 %v2139_v1  ;;  %1915 = vmatprep.subr.bf16.mxu1 %v2163_v10  ;;  %v2149_v16 = vld [vmem:[%s2565_s29 + $0x18] sm:$0xff]   ;;  %v2151_v18 = vld [vmem:[%s2565_s29 + $0x28] sm:$0xff]   ;;  %v2152_v19 = vld [vmem:[%s2565_s29 + $0x30] sm:$0xff]   ;;  %p2294_p11 = pnand %p2293_p7, %p2857_p1  ;;  %s2298_s12 = scalar_lea.vmem %s2297_s13, 8192 }
  0x6d   : > { %1869 = vmatprep.subr.bf16.mxu0 %v2140_v2  ;;  %v2153_v20 = vld [vmem:[%s2565_s29 + $0x38] sm:$0xff]   ;;  %v2154_v21 = vld [vmem:[%s2565_s29 + $0x40] sm:$0xff]   ;;  %v2155_v22 = vld [vmem:[%s2565_s29 + $0x48] sm:$0xff]   ;;  %p2299_p12 = scmp.lt.s32.totalorder %s2782_s1, %s2297_s13  ;;  %p2300_p13 = scmp.lt.s32.totalorder %s2298_s12, %s2292_s9 }
  0x6e   : > { %v2156_v23 = vld [vmem:[%s2565_s29 + $0x50] sm:$0xff]   ;;  %v2157_v24 = vld [vmem:[%s2565_s29 + $0x58] sm:$0xff]   ;;  %v2158_v25 = vld [vmem:[%s2565_s29 + $0x60] sm:$0xff]   ;;  %p2295_p9 = pneg %p2294_p11 }
  0x6f   : > { %1916 = vmatpush3.bf16.msra.mxu1 %v2163_v10  ;;  %v2159_v26 = vld [vmem:[%s2565_s29 + $0x68] sm:$0xff]   ;;  %v2160_v27 = vld [vmem:[%s2565_s29 + $0x70] sm:$0xff]   ;;  %v2161_v28 = vld [vmem:[%s2565_s29 + $0x78] sm:$0xff]   ;;  %p2301_p2 = por %p2300_p13, %p2299_p12 }
  0x70   : > { %1870 = vmatpush3.bf16.msra.mxu0 %v2140_v2  ;;  %1917 = vmatprep.subr.bf16.mxu1 %v2164_v12  ;;  %v2167_v29 = vld [vmem:[#allocation7 + $0x10] sm:$0xff]   ;;  %v2168_v30 = vld [vmem:[#allocation7 + $0x8] sm:$0xff]   ;;  %v2169_v31 = vld [vmem:[#allocation7] sm:$0xff]  }
  0x71   : > { %1871 = vmatprep.subr.bf16.mxu0 %v2141_v3  ;;  %v2170_v32 = vld [vmem:[#allocation7 + $0x78] sm:$0xff]   ;;  %v2171_v33 = vld [vmem:[#allocation7 + $0x70] sm:$0xff]   ;;  %v2172_v34 = vld [vmem:[#allocation7 + $0x68] sm:$0xff]   ;;  %p2302_p5 = pnand %p2301_p2, %p2295_p9 }
  0x72   : > { %v2173_v35 = vld [vmem:[#allocation7 + $0x60] sm:$0xff]   ;;  %v2174_v36 = vld [vmem:[#allocation7 + $0x58] sm:$0xff]   ;;  %v2175_v37 = vld [vmem:[#allocation7 + $0x50] sm:$0xff]  }
  0x73   : > { %1918 = vmatpush3.bf16.msra.mxu1 %v2164_v12  ;;  %v2176_v38 = vld [vmem:[#allocation7 + $0x48] sm:$0xff]   ;;  %v2598_v41 = vld [vmem:[%s2829_s2] ss:$0 sm:$0xff] }
  0x74   : > { %1872 = vmatpush3.bf16.msra.mxu0 %v2141_v3  ;;  %1919 = vmatprep.subr.bf16.mxu1 %v2165_v14 }
  0x75   : > { %1873 = vmatprep.subr.bf16.mxu0 %v2142_v5 }
  0x77   : > { %1920 = vmatpush3.bf16.msra.mxu1 %v2165_v14 }
  0x78   : > { %1874 = vmatpush3.bf16.msra.mxu0 %v2142_v5  ;;  %1921 = vmatprep.subr.bf16.mxu1 %v2166_v15 }
  0x79   : > { %1875 = vmatprep.subr.bf16.mxu0 %v2143_v6 }
  0x7b   : > { %1922 = vmatpush3.bf16.msra.mxu1 %v2166_v15 }
  0x7c   : > { %1876 = vmatpush3.bf16.msra.mxu0 %v2143_v6  ;;  %1923 = vmatprep.subr.bf16.mxu1 %v2167_v29 }
  0x7d   : > { %1877 = vmatprep.subr.bf16.mxu0 %v2144_v7 }
  0x7f   : > { %1924 = vmatpush3.bf16.msra.mxu1 %v2167_v29 }
  0x80   : > { %1878 = vmatpush3.bf16.msra.mxu0 %v2144_v7  ;;  %1925 = vmatprep.subr.bf16.mxu1 %v2168_v30 }
  0x81   : > { %1879 = vmatprep.subr.bf16.mxu0 %v2145_v8 }
  0x83   : > { %1926 = vmatpush3.bf16.msra.mxu1 %v2168_v30 }
  0x84   : > { %1880 = vmatpush3.bf16.msra.mxu0 %v2145_v8  ;;  %1927 = vmatprep.subr.bf16.mxu1 %v2169_v31 }
  0x85   : > { %1961 = vmatprep.subr.bf16.mxu0 %v2170_v32 }
  0x87   : > { %1882 = vmatmul.mubr.bf16.vlgmr.msra.gmra.mxu0 %v2147_v11  ;;  %1928 = vmatpush3.bf16.msra.mxu1 %v2169_v31 }
  0x88   : > { %1885 = vmatprep.mubr.bf16.mxu0 %v2148_v13  ;;  %1962 = vmatpush3.bf16.msra.mxu0 %v2170_v32 }
  0x89   : > { %1963 = vmatprep.subr.bf16.mxu0 %v2171_v33 }
  0x8c   : > { %1964 = vmatpush3.bf16.msra.mxu0 %v2171_v33 }
  0x8d   : > { %1965 = vmatprep.subr.bf16.mxu0 %v2172_v34 }
  0x8f   : > { %1886 = vmatmul.mubr.bf16.gmra.mxu0 %v2149_v16 }
  0x90   : > { %1889 = vmatprep.mubr.bf16.mxu0 %v2150_v17  ;;  %1966 = vmatpush3.bf16.msra.mxu0 %v2172_v34 }
  0x91   : > { %1967 = vmatprep.subr.bf16.mxu0 %v2173_v35 }
  0x94   : > { %1968 = vmatpush3.bf16.msra.mxu0 %v2173_v35 }
  0x95   : > { %1969 = vmatprep.subr.bf16.mxu0 %v2174_v36 }
  0x97   : > { %1890 = vmatmul.mubr.bf16.gmra.mxu0 %v2151_v18 }
  0x98   : > { %1893 = vmatprep.mubr.bf16.mxu0 %v2152_v19  ;;  %1970 = vmatpush3.bf16.msra.mxu0 %v2174_v36 }
  0x99   : > { %1971 = vmatprep.subr.bf16.mxu0 %v2175_v37 }
  0x9c   : > { %1972 = vmatpush3.bf16.msra.mxu0 %v2175_v37 }
  0x9d   : > { %1973 = vmatprep.subr.bf16.mxu0 %v2176_v38 }
  0x9f   : > { %1894 = vmatmul.mubr.bf16.gmra.mxu0 %v2153_v20 }
  0xa0   : > { %1897 = vmatprep.mubr.bf16.mxu0 %v2154_v21  ;;  %1974 = vmatpush3.bf16.msra.mxu0 %v2176_v38 }
  0xa7   : > { %1898 = vmatmul.mubr.bf16.gmra.mxu0 %v2155_v22 }
  0xa8   : > { %1901 = vmatprep.mubr.bf16.mxu0 %v2156_v23 }
  0xaf   : > { %1902 = vmatmul.mubr.bf16.gmra.mxu0 %v2157_v24 }
  0xb0   : > { %1905 = vmatprep.mubr.bf16.mxu0 %v2158_v25 }
  0xb7   : > { %1906 = vmatmul.mubr.bf16.gmra.mxu0 %v2159_v26 }
  0xb8   : > { %1909 = vmatprep.mubr.bf16.mxu0 %v2160_v27 }
  0xbf   : > { %1910 = vmatmul.mubr.bf16.gmra.mxu0 %v2161_v28 }
 0x147   : > { %v1883_v39 = vpop.f32.mrf.mxu0 }
 0x148   : > { %v586_v45 = vadd.f32 %v1883_v39, %v2598_v41 }
 0x149   : > { %v577_v40 = vpop.f32.mrf.mxu0 }
 0x14a   : > { %v578_v43 = vadd.f32 %v2598_v41, %v577_v40  ;;  %v706_v52 = vmax.f32 %v586_v45, 0.0 }
 0x14b   : > { %v1884_v42 = vpop.f32.mrf.mxu0 }
 0x14c   : > { %v589_v44 = vadd.f32 %v1884_v42, %v2598_v41  ;;  %v704_v50 = vmax.f32 %v578_v43, 0.0 }
 0x14d   : > { %v580_v46 = vpop.f32.mrf.mxu0 }
 0x14e   : > { %v581_v47 = vadd.f32 %v2598_v41, %v580_v46  ;;  %v707_v48 = vmax.f32 %v589_v44, 0.0 }
 0x14f   : > { %v1887_v49 = vpop.f32.mrf.mxu0 }
 0x150   : > { %v705_v51 = vmax.f32 %v581_v47, 0.0  ;;  %v737_v55 = vpack.c.bf16 %v707_v48, %v706_v52  ;;  %v602_v59 = vadd.f32 %v1887_v49, %v2598_v41 }
 0x151   : > { %v593_v53 = vpop.f32.mrf.mxu0 }
 0x152   : > { %v736_v54 = vpack.c.bf16 %v705_v51, %v704_v50  ;;  %v594_v57 = vadd.f32 %v2598_v41, %v593_v53  ;;  %v710_v2 = vmax.f32 %v602_v59, 0.0 }
 0x153   : > { %v1888_v56 = vpop.f32.mrf.mxu0 }
 0x154   : > { %v605_v58 = vadd.f32 %v1888_v56, %v2598_v41  ;;  %1929 = vmatprep.mubr.bf16.mxu1 %v736_v54  ;;  %v708_v0 = vmax.f32 %v594_v57, 0.0 }
 0x155   : > { %v596_v60 = vpop.f32.mrf.mxu0  ;;  %1930 = vmatmul.mubr.bf16.vlgmr.msra.gmra.mxu1 %v737_v55 }
 0x156   : > { %v597_v61 = vadd.f32 %v2598_v41, %v596_v60  ;;  %v711_v62 = vmax.f32 %v605_v58, 0.0 }
 0x157   : > { %v1891_v63 = vpop.f32.mrf.mxu0 }
 0x158   : > { %v709_v1 = vmax.f32 %v597_v61, 0.0  ;;  %v739_v5 = vpack.c.bf16 %v711_v62, %v710_v2  ;;  %v618_v9 = vadd.f32 %v1891_v63, %v2598_v41 }
 0x159   : > { %v609_v3 = vpop.f32.mrf.mxu0 }
 0x15a   : > { %v738_v4 = vpack.c.bf16 %v709_v1, %v708_v0  ;;  %v610_v7 = vadd.f32 %v2598_v41, %v609_v3  ;;  %v714_v16 = vmax.f32 %v618_v9, 0.0 }
 0x15b   : > { %v1892_v6 = vpop.f32.mrf.mxu0 }
 0x15c   : > { %v621_v8 = vadd.f32 %v1892_v6, %v2598_v41  ;;  %1933 = vmatprep.mubr.bf16.mxu1 %v738_v4  ;;  %v712_v14 = vmax.f32 %v610_v7, 0.0 }
 0x15d   : > { %v612_v10 = vpop.f32.mrf.mxu0  ;;  %1934 = vmatmul.mubr.bf16.gmra.mxu1 %v739_v5 }
 0x15e   : > { %v613_v11 = vadd.f32 %v2598_v41, %v612_v10  ;;  %v715_v12 = vmax.f32 %v621_v8, 0.0 }
 0x15f   : > { %v1895_v13 = vpop.f32.mrf.mxu0 }
 0x160   : > { %v713_v15 = vmax.f32 %v613_v11, 0.0  ;;  %v741_v19 = vpack.c.bf16 %v715_v12, %v714_v16  ;;  %v634_v23 = vadd.f32 %v1895_v13, %v2598_v41 }
 0x161   : > { %v625_v17 = vpop.f32.mrf.mxu0 }
 0x162   : > { %v740_v18 = vpack.c.bf16 %v713_v15, %v712_v14  ;;  %v626_v21 = vadd.f32 %v2598_v41, %v625_v17  ;;  %v718_v30 = vmax.f32 %v634_v23, 0.0 }
 0x163   : > { %v1896_v20 = vpop.f32.mrf.mxu0 }
 0x164   : > { %v637_v22 = vadd.f32 %v1896_v20, %v2598_v41  ;;  %1937 = vmatprep.mubr.bf16.mxu1 %v740_v18  ;;  %v716_v28 = vmax.f32 %v626_v21, 0.0 }
 0x165   : > { %v628_v24 = vpop.f32.mrf.mxu0  ;;  %1938 = vmatmul.mubr.bf16.gmra.mxu1 %v741_v19 }
 0x166   : > { %v629_v25 = vadd.f32 %v2598_v41, %v628_v24  ;;  %v719_v26 = vmax.f32 %v637_v22, 0.0 }
 0x167   : > { %v1899_v27 = vpop.f32.mrf.mxu0 }
 0x168   : > { %v717_v29 = vmax.f32 %v629_v25, 0.0  ;;  %v743_v33 = vpack.c.bf16 %v719_v26, %v718_v30  ;;  %v650_v37 = vadd.f32 %v1899_v27, %v2598_v41  ;;  %v2177_v25 = vld [vmem:[#allocation7 + $0x40] sm:$0xff]   ;;  %v2178_v26 = vld [vmem:[#allocation8 + $0x38] sm:$0xff]   ;;  %v2179_v27 = vld [vmem:[#allocation8 + $0x30] sm:$0xff]  }
 0x169   : > { %v641_v31 = vpop.f32.mrf.mxu0  ;;  %1975 = vmatprep.subr.bf16.mxu0 %v2177_v25  ;;  %2009 = vmatprep.subr.bf16.mxu1 %v2178_v26  ;;  %v2183_v30 = vld [vmem:[#allocation8 + $0x10] sm:$0xff]  }
 0x16a   : > { %v742_v32 = vpack.c.bf16 %v717_v29, %v716_v28  ;;  %v642_v35 = vadd.f32 %v2598_v41, %v641_v31  ;;  %v722_v45 = vmax.f32 %v650_v37, 0.0  ;;  %1976 = vmatpush3.bf16.msra.mxu0 %v2177_v25  ;;  %2010 = vmatpush3.bf16.msra.mxu1 %v2178_v26  ;;  %v2180_v28 = vld [vmem:[#allocation8 + $0x28] sm:$0xff]   ;;  %v2182_v29 = vld [vmem:[#allocation8 + $0x18] sm:$0xff]  }
 0x16b   : > { %v1900_v34 = vpop.f32.mrf.mxu0  ;;  %2011 = vmatprep.subr.bf16.mxu1 %v2179_v27  ;;  %v2184_v31 = vld [vmem:[#allocation8 + $0x8] sm:$0xff]  }
 0x16c   : > { %v653_v36 = vadd.f32 %v1900_v34, %v2598_v41  ;;  %1941 = vmatprep.mubr.bf16.mxu1 %v742_v32  ;;  %v720_v43 = vmax.f32 %v642_v35, 0.0  ;;  %v2635_v34 = vld [vmem:[%s2831_s4] ss:$0 sm:$0xff] }
 0x16d   : > { %v644_v38 = vpop.f32.mrf.mxu0  ;;  %1942 = vmatmul.mubr.bf16.gmra.mxu1 %v743_v33 }
 0x16e   : > { %v645_v39 = vadd.f32 %v2598_v41, %v644_v38  ;;  %v723_v40 = vmax.f32 %v653_v36, 0.0  ;;  %2012 = vmatpush3.bf16.msra.mxu1 %v2179_v27 }
 0x16f   : > { %v1903_v42 = vpop.f32.mrf.mxu0  ;;  %2013 = vmatprep.subr.bf16.mxu1 %v2180_v28 }
 0x170   : > { %v721_v44 = vmax.f32 %v645_v39, 0.0  ;;  %v745_v48 = vpack.c.bf16 %v723_v40, %v722_v45  ;;  %v666_v52 = vadd.f32 %v1903_v42, %v2598_v41 }
 0x171   : > { %v657_v46 = vpop.f32.mrf.mxu0 }
 0x172   : > { %v744_v47 = vpack.c.bf16 %v721_v44, %v720_v43  ;;  %v658_v50 = vadd.f32 %v2598_v41, %v657_v46  ;;  %v726_v59 = vmax.f32 %v666_v52, 0.0  ;;  %2014 = vmatpush3.bf16.msra.mxu1 %v2180_v28 }
 0x173   : > { %v1904_v49 = vpop.f32.mrf.mxu0 }
 0x174   : > { %v669_v51 = vadd.f32 %v1904_v49, %v2598_v41  ;;  %1945 = vmatprep.mubr.bf16.mxu1 %v744_v47  ;;  %v724_v57 = vmax.f32 %v658_v50, 0.0 }
 0x175   : > { %v660_v53 = vpop.f32.mrf.mxu0  ;;  %1946 = vmatmul.mubr.bf16.gmra.mxu1 %v745_v48 }
 0x176   : > { %v661_v54 = vadd.f32 %v2598_v41, %v660_v53  ;;  %v727_v55 = vmax.f32 %v669_v51, 0.0 }
 0x177   : > { %v1907_v56 = vpop.f32.mrf.mxu0 }
 0x178   : > { %v725_v58 = vmax.f32 %v661_v54, 0.0  ;;  %v747_v62 = vpack.c.bf16 %v727_v55, %v726_v59  ;;  %v682_v2 = vadd.f32 %v1907_v56, %v2598_v41 }
 0x179   : > { %v673_v60 = vpop.f32.mrf.mxu0 }
 0x17a   : > { %v746_v61 = vpack.c.bf16 %v725_v58, %v724_v57  ;;  %v674_v0 = vadd.f32 %v2598_v41, %v673_v60  ;;  %v730_v9 = vmax.f32 %v682_v2, 0.0 }
 0x17b   : > { %v1908_v63 = vpop.f32.mrf.mxu0 }
 0x17c   : > { %v685_v1 = vadd.f32 %v1908_v63, %v2598_v41  ;;  %1949 = vmatprep.mubr.bf16.mxu1 %v746_v61  ;;  %v728_v7 = vmax.f32 %v674_v0, 0.0 }
 0x17d   : > { %v676_v3 = vpop.f32.mrf.mxu0  ;;  %1950 = vmatmul.mubr.bf16.gmra.mxu1 %v747_v62 }
 0x17e   : > { %v677_v4 = vadd.f32 %v2598_v41, %v676_v3  ;;  %v731_v5 = vmax.f32 %v685_v1, 0.0 }
 0x17f   : > { %v1911_v6 = vpop.f32.mrf.mxu0 }
 0x180   : > { %v729_v8 = vmax.f32 %v677_v4, 0.0  ;;  %v749_v12 = vpack.c.bf16 %v731_v5, %v730_v9  ;;  %v698_v16 = vadd.f32 %v1911_v6, %v2598_v41 }
 0x181   : > { %v689_v10 = vpop.f32.mrf.mxu0 }
 0x182   : > { %v748_v11 = vpack.c.bf16 %v729_v8, %v728_v7  ;;  %v690_v14 = vadd.f32 %v2598_v41, %v689_v10  ;;  %v734_v22 = vmax.f32 %v698_v16, 0.0 }
 0x183   : > { %v1912_v13 = vpop.f32.mrf.mxu0 }
 0x184   : > { %v701_v15 = vadd.f32 %v1912_v13, %v2598_v41  ;;  %1953 = vmatprep.mubr.bf16.mxu1 %v748_v11  ;;  %v732_v20 = vmax.f32 %v690_v14, 0.0 }
 0x185   : > { %v692_v17 = vpop.f32.mrf.mxu0  ;;  %1954 = vmatmul.mubr.bf16.gmra.mxu1 %v749_v12 }
 0x186   : > { %v693_v18 = vadd.f32 %v2598_v41, %v692_v17  ;;  %v735_v19 = vmax.f32 %v701_v15, 0.0  ;;  %v2181_v41 = vld [vmem:[#allocation8 + $0x20] sm:$0xff]  }
 0x187   : > { %2015 = vmatprep.subr.bf16.mxu1 %v2181_v41 }
 0x188   : > { %v733_v21 = vmax.f32 %v693_v18, 0.0  ;;  %v751_v24 = vpack.c.bf16 %v735_v19, %v734_v22  ;;  %2016 = vmatpush3.bf16.msra.mxu1 %v2181_v41 }
 0x189   : > { %2017 = vmatprep.subr.bf16.mxu1 %v2182_v29 }
 0x18a   : > { %v750_v23 = vpack.c.bf16 %v733_v21, %v732_v20 }
 0x18c   : > { %1957 = vmatprep.mubr.bf16.mxu1 %v750_v23  ;;  %2018 = vmatpush3.bf16.msra.mxu1 %v2182_v29 }
 0x18d   : > { %1958 = vmatmul.mubr.bf16.gmra.mxu1 %v751_v24  ;;  %2019 = vmatprep.subr.bf16.mxu1 %v2183_v30 }
 0x190   : > { %2020 = vmatpush3.bf16.msra.mxu1 %v2183_v30 }
 0x191   : > { %2021 = vmatprep.subr.bf16.mxu1 %v2184_v31 }
 0x194   : > { %2022 = vmatpush3.bf16.msra.mxu1 %v2184_v31 }
 0x215   : > { %v1931_v32 = vpop.f32.mrf.mxu1 }
 0x216   : > { %v866_v38 = vadd.f32 %v1931_v32, %v2635_v34 }
 0x217   : > { %v857_v33 = vpop.f32.mrf.mxu1 }
 0x218   : > { %v858_v36 = vadd.f32 %v2635_v34, %v857_v33  ;;  %v986_v46 = vmax.f32 %v866_v38, 0.0 }
 0x219   : > { %v1932_v35 = vpop.f32.mrf.mxu1 }
 0x21a   : > { %v869_v37 = vadd.f32 %v1932_v35, %v2635_v34  ;;  %v984_v44 = vmax.f32 %v858_v36, 0.0 }
 0x21b   : > { %v860_v39 = vpop.f32.mrf.mxu1 }
 0x21c   : > { %v861_v40 = vadd.f32 %v2635_v34, %v860_v39  ;;  %v987_v42 = vmax.f32 %v869_v37, 0.0 }
 0x21d   : > { %v1935_v43 = vpop.f32.mrf.mxu1 }
 0x21e   : > { %v985_v45 = vmax.f32 %v861_v40, 0.0  ;;  %v1017_v49 = vpack.c.bf16 %v987_v42, %v986_v46  ;;  %v882_v53 = vadd.f32 %v1935_v43, %v2635_v34 }
 0x21f   : > { %v873_v47 = vpop.f32.mrf.mxu1 }
 0x220   : > { %v1016_v48 = vpack.c.bf16 %v985_v45, %v984_v44  ;;  %v874_v51 = vadd.f32 %v2635_v34, %v873_v47  ;;  %v990_v60 = vmax.f32 %v882_v53, 0.0 }
 0x221   : > { %v1936_v50 = vpop.f32.mrf.mxu1 }
 0x222   : > { %v885_v52 = vadd.f32 %v1936_v50, %v2635_v34  ;;  %1977 = vmatprep.mubr.bf16.mxu0 %v1016_v48  ;;  %v988_v58 = vmax.f32 %v874_v51, 0.0 }
 0x223   : > { %v876_v54 = vpop.f32.mrf.mxu1  ;;  %1978 = vmatmul.mubr.bf16.vlgmr.msra.gmra.mxu0 %v1017_v49 }
 0x224   : > { %v877_v55 = vadd.f32 %v2635_v34, %v876_v54  ;;  %v991_v56 = vmax.f32 %v885_v52, 0.0 }
 0x225   : > { %v1939_v57 = vpop.f32.mrf.mxu1 }
 0x226   : > { %v989_v59 = vmax.f32 %v877_v55, 0.0  ;;  %v1019_v63 = vpack.c.bf16 %v991_v56, %v990_v60  ;;  %v898_v3 = vadd.f32 %v1939_v57, %v2635_v34 }
 0x227   : > { %v889_v61 = vpop.f32.mrf.mxu1 }
 0x228   : > { %v1018_v62 = vpack.c.bf16 %v989_v59, %v988_v58  ;;  %v890_v1 = vadd.f32 %v2635_v34, %v889_v61  ;;  %v994_v10 = vmax.f32 %v898_v3, 0.0 }
 0x229   : > { %v1940_v0 = vpop.f32.mrf.mxu1 }
 0x22a   : > { %v901_v2 = vadd.f32 %v1940_v0, %v2635_v34  ;;  %1981 = vmatprep.mubr.bf16.mxu0 %v1018_v62  ;;  %v992_v8 = vmax.f32 %v890_v1, 0.0 }
 0x22b   : > { %v892_v4 = vpop.f32.mrf.mxu1  ;;  %1982 = vmatmul.mubr.bf16.gmra.mxu0 %v1019_v63 }
 0x22c   : > { %v893_v5 = vadd.f32 %v2635_v34, %v892_v4  ;;  %v995_v6 = vmax.f32 %v901_v2, 0.0 }
 0x22d   : > { %v1943_v7 = vpop.f32.mrf.mxu1 }
 0x22e   : > { %v993_v9 = vmax.f32 %v893_v5, 0.0  ;;  %v1021_v13 = vpack.c.bf16 %v995_v6, %v994_v10  ;;  %v914_v17 = vadd.f32 %v1943_v7, %v2635_v34 }
 0x22f   : > { %v905_v11 = vpop.f32.mrf.mxu1 }
 0x230   : > { %v1020_v12 = vpack.c.bf16 %v993_v9, %v992_v8  ;;  %v906_v15 = vadd.f32 %v2635_v34, %v905_v11  ;;  %v998_v24 = vmax.f32 %v914_v17, 0.0 }
 0x231   : > { %v1944_v14 = vpop.f32.mrf.mxu1 }
 0x232   : > { %v917_v16 = vadd.f32 %v1944_v14, %v2635_v34  ;;  %1985 = vmatprep.mubr.bf16.mxu0 %v1020_v12  ;;  %v996_v22 = vmax.f32 %v906_v15, 0.0 }
 0x233   : > { %v908_v18 = vpop.f32.mrf.mxu1  ;;  %1986 = vmatmul.mubr.bf16.gmra.mxu0 %v1021_v13 }
 0x234   : > { %v909_v19 = vadd.f32 %v2635_v34, %v908_v18  ;;  %v999_v20 = vmax.f32 %v917_v16, 0.0 }
 0x235   : > { %v1947_v21 = vpop.f32.mrf.mxu1 }
 0x236   : > { %v997_v23 = vmax.f32 %v909_v19, 0.0  ;;  %v1023_v27 = vpack.c.bf16 %v999_v20, %v998_v24  ;;  %v930_v30 = vadd.f32 %v1947_v21, %v2635_v34  ;;  %v2185_v19 = vld [vmem:[#allocation8] sm:$0xff]  }
 0x237   : > { %v921_v25 = vpop.f32.mrf.mxu1  ;;  %2023 = vmatprep.subr.bf16.mxu1 %v2185_v19 }
 0x238   : > { %v1022_v26 = vpack.c.bf16 %v997_v23, %v996_v22  ;;  %v922_v41 = vadd.f32 %v2635_v34, %v921_v25  ;;  %v1002_v38 = vmax.f32 %v930_v30, 0.0  ;;  %2024 = vmatpush3.bf16.msra.mxu1 %v2185_v19  ;;  %v2672_v22 = vld [vmem:[%s2831_s4 + $0x1] ss:$0 sm:$0xff] }
 0x239   : > { %v1948_v28 = vpop.f32.mrf.mxu1 }
 0x23a   : > { %v933_v29 = vadd.f32 %v1948_v28, %v2635_v34  ;;  %1989 = vmatprep.mubr.bf16.mxu0 %v1022_v26  ;;  %v1000_v36 = vmax.f32 %v922_v41, 0.0 }
 0x23b   : > { %v924_v31 = vpop.f32.mrf.mxu1  ;;  %1990 = vmatmul.mubr.bf16.gmra.mxu0 %v1023_v27 }
 0x23c   : > { %v925_v32 = vadd.f32 %v2635_v34, %v924_v31  ;;  %v1003_v33 = vmax.f32 %v933_v29, 0.0 }
 0x23d   : > { %v1951_v35 = vpop.f32.mrf.mxu1 }
 0x23e   : > { %v1001_v37 = vmax.f32 %v925_v32, 0.0  ;;  %v1025_v42 = vpack.c.bf16 %v1003_v33, %v1002_v38  ;;  %v946_v46 = vadd.f32 %v1951_v35, %v2635_v34 }
 0x23f   : > { %v937_v39 = vpop.f32.mrf.mxu1 }
 0x240   : > { %v1024_v40 = vpack.c.bf16 %v1001_v37, %v1000_v36  ;;  %v938_v44 = vadd.f32 %v2635_v34, %v937_v39  ;;  %v1006_v53 = vmax.f32 %v946_v46, 0.0 }
 0x241   : > { %v1952_v43 = vpop.f32.mrf.mxu1 }
 0x242   : > { %v949_v45 = vadd.f32 %v1952_v43, %v2635_v34  ;;  %1993 = vmatprep.mubr.bf16.mxu0 %v1024_v40  ;;  %v1004_v51 = vmax.f32 %v938_v44, 0.0 }
 0x243   : > { %v940_v47 = vpop.f32.mrf.mxu1  ;;  %1994 = vmatmul.mubr.bf16.gmra.mxu0 %v1025_v42 }
 0x244   : > { %v941_v48 = vadd.f32 %v2635_v34, %v940_v47  ;;  %v1007_v49 = vmax.f32 %v949_v45, 0.0 }
 0x245   : > { %v1955_v50 = vpop.f32.mrf.mxu1 }
 0x246   : > { %v1005_v52 = vmax.f32 %v941_v48, 0.0  ;;  %v1027_v56 = vpack.c.bf16 %v1007_v49, %v1006_v53  ;;  %v962_v60 = vadd.f32 %v1955_v50, %v2635_v34 }
 0x247   : > { %v953_v54 = vpop.f32.mrf.mxu1 }
 0x248   : > { %v1026_v55 = vpack.c.bf16 %v1005_v52, %v1004_v51  ;;  %v954_v58 = vadd.f32 %v2635_v34, %v953_v54  ;;  %v1010_v3 = vmax.f32 %v962_v60, 0.0 }
 0x249   : > { %v1956_v57 = vpop.f32.mrf.mxu1 }
 0x24a   : > { %v965_v59 = vadd.f32 %v1956_v57, %v2635_v34  ;;  %1997 = vmatprep.mubr.bf16.mxu0 %v1026_v55  ;;  %v1008_v1 = vmax.f32 %v954_v58, 0.0 }
 0x24b   : > { %v956_v61 = vpop.f32.mrf.mxu1  ;;  %1998 = vmatmul.mubr.bf16.gmra.mxu0 %v1027_v56 }
 0x24c   : > { %v957_v62 = vadd.f32 %v2635_v34, %v956_v61  ;;  %v1011_v63 = vmax.f32 %v965_v59, 0.0 }
 0x24d   : > { %v1959_v0 = vpop.f32.mrf.mxu1 }
 0x24e   : > { %v1009_v2 = vmax.f32 %v957_v62, 0.0  ;;  %v1029_v6 = vpack.c.bf16 %v1011_v63, %v1010_v3  ;;  %v978_v10 = vadd.f32 %v1959_v0, %v2635_v34 }
 0x24f   : > { %v969_v4 = vpop.f32.mrf.mxu1 }
 0x250   : > { %v1028_v5 = vpack.c.bf16 %v1009_v2, %v1008_v1  ;;  %v970_v8 = vadd.f32 %v2635_v34, %v969_v4  ;;  %v1014_v16 = vmax.f32 %v978_v10, 0.0 }
 0x251   : > { %v1960_v7 = vpop.f32.mrf.mxu1 }
 0x252   : > { %v981_v9 = vadd.f32 %v1960_v7, %v2635_v34  ;;  %2001 = vmatprep.mubr.bf16.mxu0 %v1028_v5  ;;  %v1012_v14 = vmax.f32 %v970_v8, 0.0 }
 0x253   : > { %v972_v11 = vpop.f32.mrf.mxu1  ;;  %2002 = vmatmul.mubr.bf16.gmra.mxu0 %v1029_v6 }
 0x254   : > { %v973_v12 = vadd.f32 %v2635_v34, %v972_v11  ;;  %v1015_v13 = vmax.f32 %v981_v9, 0.0 }
 0x256   : > { %v1013_v15 = vmax.f32 %v973_v12, 0.0  ;;  %v1031_v18 = vpack.c.bf16 %v1015_v13, %v1014_v16 }
 0x258   : > { %v1030_v17 = vpack.c.bf16 %v1013_v15, %v1012_v14 }
 0x25a   : > { %2005 = vmatprep.mubr.bf16.mxu0 %v1030_v17 }
 0x25b   : > { %2006 = vmatmul.mubr.bf16.gmra.mxu0 %v1031_v18 }
 0x2e3   : > { %v1979_v20 = vpop.f32.mrf.mxu0 }
 0x2e4   : > { %v1148_v25 = vadd.f32 %v1979_v20, %v2672_v22 }
 0x2e5   : > { %v1139_v21 = vpop.f32.mrf.mxu0 }
 0x2e6   : > { %v1140_v34 = vadd.f32 %v2672_v22, %v1139_v21  ;;  %v1268_v31 = vmax.f32 %v1148_v25, 0.0 }
 0x2e7   : > { %v1980_v23 = vpop.f32.mrf.mxu0 }
 0x2e8   : > { %v1151_v24 = vadd.f32 %v1980_v23, %v2672_v22  ;;  %v1266_v29 = vmax.f32 %v1140_v34, 0.0 }
 0x2e9   : > { %v1142_v26 = vpop.f32.mrf.mxu0 }
 0x2ea   : > { %v1143_v27 = vadd.f32 %v2672_v22, %v1142_v26  ;;  %v1269_v28 = vmax.f32 %v1151_v24, 0.0 }
 0x2eb   : > { %v1983_v41 = vpop.f32.mrf.mxu0 }
 0x2ec   : > { %v1267_v30 = vmax.f32 %v1143_v27, 0.0  ;;  %v1299_v35 = vpack.c.bf16 %v1269_v28, %v1268_v31  ;;  %v1164_v39 = vadd.f32 %v1983_v41, %v2672_v22 }
 0x2ed   : > { %v1155_v32 = vpop.f32.mrf.mxu0 }
 0x2ee   : > { %v1298_v33 = vpack.c.bf16 %v1267_v30, %v1266_v29  ;;  %v1156_v37 = vadd.f32 %v2672_v22, %v1155_v32  ;;  %v1272_v47 = vmax.f32 %v1164_v39, 0.0 }
 0x2ef   : > { %v1984_v36 = vpop.f32.mrf.mxu0 }
 0x2f0   : > { %v1167_v38 = vadd.f32 %v1984_v36, %v2672_v22  ;;  %2025 = vmatprep.mubr.bf16.mxu1 %v1298_v33  ;;  %v1270_v45 = vmax.f32 %v1156_v37, 0.0 }
 0x2f1   : > { %v1158_v40 = vpop.f32.mrf.mxu0  ;;  %2026 = vmatmul.mubr.bf16.vlgmr.msra.gmra.mxu1 %v1299_v35 }
 0x2f2   : > { %v1159_v42 = vadd.f32 %v2672_v22, %v1158_v40  ;;  %v1273_v43 = vmax.f32 %v1167_v38, 0.0 }
 0x2f3   : > { %v1987_v44 = vpop.f32.mrf.mxu0 }
 0x2f4   : > { %v1271_v46 = vmax.f32 %v1159_v42, 0.0  ;;  %v1301_v50 = vpack.c.bf16 %v1273_v43, %v1272_v47  ;;  %v1180_v54 = vadd.f32 %v1987_v44, %v2672_v22 }
 0x2f5   : > { %v1171_v48 = vpop.f32.mrf.mxu0 }
 0x2f6   : > { %v1300_v49 = vpack.c.bf16 %v1271_v46, %v1270_v45  ;;  %v1172_v52 = vadd.f32 %v2672_v22, %v1171_v48  ;;  %v1276_v61 = vmax.f32 %v1180_v54, 0.0 }
 0x2f7   : > { %v1988_v51 = vpop.f32.mrf.mxu0 }
 0x2f8   : > { %v1183_v53 = vadd.f32 %v1988_v51, %v2672_v22  ;;  %2029 = vmatprep.mubr.bf16.mxu1 %v1300_v49  ;;  %v1274_v59 = vmax.f32 %v1172_v52, 0.0 }
 0x2f9   : > { %v1174_v55 = vpop.f32.mrf.mxu0  ;;  %2030 = vmatmul.mubr.bf16.gmra.mxu1 %v1301_v50 }
 0x2fa   : > { %v1175_v56 = vadd.f32 %v2672_v22, %v1174_v55  ;;  %v1277_v57 = vmax.f32 %v1183_v53, 0.0 }
 0x2fb   : > { %v1991_v58 = vpop.f32.mrf.mxu0 }
 0x2fc   : > { %v1275_v60 = vmax.f32 %v1175_v56, 0.0  ;;  %v1303_v0 = vpack.c.bf16 %v1277_v57, %v1276_v61  ;;  %v1196_v4 = vadd.f32 %v1991_v58, %v2672_v22 }
 0x2fd   : > { %v1187_v62 = vpop.f32.mrf.mxu0 }
 0x2fe   : > { %v1302_v63 = vpack.c.bf16 %v1275_v60, %v1274_v59  ;;  %v1188_v2 = vadd.f32 %v2672_v22, %v1187_v62  ;;  %v1280_v11 = vmax.f32 %v1196_v4, 0.0 }
 0x2ff   : > { %v1992_v1 = vpop.f32.mrf.mxu0 }
 0x300   : > { %v1199_v3 = vadd.f32 %v1992_v1, %v2672_v22  ;;  %2033 = vmatprep.mubr.bf16.mxu1 %v1302_v63  ;;  %v1278_v9 = vmax.f32 %v1188_v2, 0.0 }
 0x301   : > { %v1190_v5 = vpop.f32.mrf.mxu0  ;;  %2034 = vmatmul.mubr.bf16.gmra.mxu1 %v1303_v0 }
 0x302   : > { %v1191_v6 = vadd.f32 %v2672_v22, %v1190_v5  ;;  %v1281_v7 = vmax.f32 %v1199_v3, 0.0 }
 0x303   : > { %v1995_v8 = vpop.f32.mrf.mxu0 }
 0x304   : > { %v1279_v10 = vmax.f32 %v1191_v6, 0.0  ;;  %v1305_v14 = vpack.c.bf16 %v1281_v7, %v1280_v11  ;;  %v1212_v18 = vadd.f32 %v1995_v8, %v2672_v22  ;;  %v2710_v6 = vld [vmem:[%s2833_s6] ss:$0 sm:$0xff] }
 0x305   : > { %v1203_v12 = vpop.f32.mrf.mxu0 }
 0x306   : > { %v1304_v13 = vpack.c.bf16 %v1279_v10, %v1278_v9  ;;  %v1204_v16 = vadd.f32 %v2672_v22, %v1203_v12  ;;  %v1284_v25 = vmax.f32 %v1212_v18, 0.0 }
 0x307   : > { %v1996_v15 = vpop.f32.mrf.mxu0 }
 0x308   : > { %v1215_v17 = vadd.f32 %v1996_v15, %v2672_v22  ;;  %2037 = vmatprep.mubr.bf16.mxu1 %v1304_v13  ;;  %v1282_v34 = vmax.f32 %v1204_v16, 0.0 }
 0x309   : > { %v1206_v19 = vpop.f32.mrf.mxu0  ;;  %2038 = vmatmul.mubr.bf16.gmra.mxu1 %v1305_v14 }
 0x30a   : > { %v1207_v20 = vadd.f32 %v2672_v22, %v1206_v19  ;;  %v1285_v21 = vmax.f32 %v1215_v17, 0.0 }
 0x30b   : > { %v1999_v23 = vpop.f32.mrf.mxu0 }
 0x30c   : > { %v1283_v24 = vmax.f32 %v1207_v20, 0.0  ;;  %v1307_v28 = vpack.c.bf16 %v1285_v21, %v1284_v25  ;;  %v1228_v31 = vadd.f32 %v1999_v23, %v2672_v22 }
 0x30d   : > { %v1219_v26 = vpop.f32.mrf.mxu0 }
 0x30e   : > { %v1306_v27 = vpack.c.bf16 %v1283_v24, %v1282_v34  ;;  %v1220_v29 = vadd.f32 %v2672_v22, %v1219_v26  ;;  %v1288_v39 = vmax.f32 %v1228_v31, 0.0 }
 0x30f   : > { %v2000_v41 = vpop.f32.mrf.mxu0 }
 0x310   : > { %v1231_v30 = vadd.f32 %v2000_v41, %v2672_v22  ;;  %2041 = vmatprep.mubr.bf16.mxu1 %v1306_v27  ;;  %v1286_v37 = vmax.f32 %v1220_v29, 0.0 }
 0x311   : > { %v1222_v32 = vpop.f32.mrf.mxu0  ;;  %2042 = vmatmul.mubr.bf16.gmra.mxu1 %v1307_v28 }
 0x312   : > { %v1223_v33 = vadd.f32 %v2672_v22, %v1222_v32  ;;  %v1289_v35 = vmax.f32 %v1231_v30, 0.0 }
 0x313   : > { %v2003_v36 = vpop.f32.mrf.mxu0 }
 0x314   : > { %v1287_v38 = vmax.f32 %v1223_v33, 0.0  ;;  %v1309_v43 = vpack.c.bf16 %v1289_v35, %v1288_v39  ;;  %v1244_v47 = vadd.f32 %v2003_v36, %v2672_v22 }
 0x315   : > { %v1235_v40 = vpop.f32.mrf.mxu0 }
 0x316   : > { %v1308_v42 = vpack.c.bf16 %v1287_v38, %v1286_v37  ;;  %v1236_v45 = vadd.f32 %v2672_v22, %v1235_v40  ;;  %v1292_v54 = vmax.f32 %v1244_v47, 0.0 }
 0x317   : > { %v2004_v44 = vpop.f32.mrf.mxu0 }
 0x318   : > { %v1247_v46 = vadd.f32 %v2004_v44, %v2672_v22  ;;  %2045 = vmatprep.mubr.bf16.mxu1 %v1308_v42  ;;  %v1290_v52 = vmax.f32 %v1236_v45, 0.0 }
 0x319   : > { %v1238_v48 = vpop.f32.mrf.mxu0  ;;  %2046 = vmatmul.mubr.bf16.gmra.mxu1 %v1309_v43 }
 0x31a   : > { %v1239_v49 = vadd.f32 %v2672_v22, %v1238_v48  ;;  %v1293_v50 = vmax.f32 %v1247_v46, 0.0 }
 0x31b   : > { %v2007_v51 = vpop.f32.mrf.mxu0 }
 0x31c   : > { %v1291_v53 = vmax.f32 %v1239_v49, 0.0  ;;  %v1311_v57 = vpack.c.bf16 %v1293_v50, %v1292_v54  ;;  %v1260_v61 = vadd.f32 %v2007_v51, %v2672_v22 }
 0x31d   : > { %v1251_v55 = vpop.f32.mrf.mxu0 }
 0x31e   : > { %v1310_v56 = vpack.c.bf16 %v1291_v53, %v1290_v52  ;;  %v1252_v59 = vadd.f32 %v2672_v22, %v1251_v55  ;;  %v1296_v3 = vmax.f32 %v1260_v61, 0.0 }
 0x31f   : > { %v2008_v58 = vpop.f32.mrf.mxu0 }
 0x320   : > { %v1263_v60 = vadd.f32 %v2008_v58, %v2672_v22  ;;  %2049 = vmatprep.mubr.bf16.mxu1 %v1310_v56  ;;  %v1294_v1 = vmax.f32 %v1252_v59, 0.0 }
 0x321   : > { %v1254_v62 = vpop.f32.mrf.mxu0  ;;  %2050 = vmatmul.mubr.bf16.gmra.mxu1 %v1311_v57 }
 0x322   : > { %v1255_v63 = vadd.f32 %v2672_v22, %v1254_v62  ;;  %v1297_v0 = vmax.f32 %v1263_v60, 0.0 }
 0x324   : > { %v1295_v2 = vmax.f32 %v1255_v63, 0.0  ;;  %v1313_v5 = vpack.c.bf16 %v1297_v0, %v1296_v3 }
 0x326   : > { %v1312_v4 = vpack.c.bf16 %v1295_v2, %v1294_v1 }
 0x328   : > { %2053 = vmatprep.mubr.bf16.mxu1 %v1312_v4 }
 0x329   : > { %2054 = vmatmul.mubr.bf16.gmra.mxu1 %v1313_v5 }
 0x3b1   : > { %v2027_v7 = vpop.f32.mrf.mxu1 }
 0x3b2   : > { %v1428_v8 = vadd.f32 %v2027_v7, %v2710_v6 }
 0x3b3   : > { %v1419_v9 = vpop.f32.mrf.mxu1 }
 0x3b4   : > { %1548 = vst [vmem:[%s2713_s18 + $0x10] sm:$0xff] %v1428_v8  ;;  %v1420_v22 = vadd.f32 %v2710_v6, %v1419_v9 }
 0x3b5   : > { %v2028_v10 = vpop.f32.mrf.mxu1 }
 0x3b6   : > { %1546 = vst [vmem:[%s2713_s18] sm:$0xff] %v1420_v22  ;;  %v1431_v11 = vadd.f32 %v2028_v10, %v2710_v6 }
 0x3b7   : > { %v1422_v12 = vpop.f32.mrf.mxu1 }
 0x3b8   : > { %1549 = vst [vmem:[%s2713_s18 + $0x18] sm:$0xff] %v1431_v11  ;;  %v1423_v13 = vadd.f32 %v2710_v6, %v1422_v12 }
 0x3b9   : > { %v2031_v14 = vpop.f32.mrf.mxu1 }
 0x3ba   : > { %1547 = vst [vmem:[%s2713_s18 + $0x8] sm:$0xff] %v1423_v13  ;;  %v1444_v15 = vadd.f32 %v2031_v14, %v2710_v6 }
 0x3bb   : > { %v1435_v16 = vpop.f32.mrf.mxu1 }
 0x3bc   : > { %1552 = vst [vmem:[%s2713_s18 + $0x30] sm:$0xff] %v1444_v15  ;;  %v1436_v17 = vadd.f32 %v2710_v6, %v1435_v16 }
 0x3bd   : > { %v2032_v18 = vpop.f32.mrf.mxu1 }
 0x3be   : > { %1550 = vst [vmem:[%s2713_s18 + $0x20] sm:$0xff] %v1436_v17  ;;  %v1447_v19 = vadd.f32 %v2032_v18, %v2710_v6 }
 0x3bf   : > { %v1438_v20 = vpop.f32.mrf.mxu1 }
 0x3c0   : > { %1553 = vst [vmem:[%s2713_s18 + $0x38] sm:$0xff] %v1447_v19  ;;  %v1439_v21 = vadd.f32 %v2710_v6, %v1438_v20 }
 0x3c1   : > { %v2035_v23 = vpop.f32.mrf.mxu1 }
 0x3c2   : > { %1551 = vst [vmem:[%s2713_s18 + $0x28] sm:$0xff] %v1439_v21  ;;  %v1460_v34 = vadd.f32 %v2035_v23, %v2710_v6 }
 0x3c3   : > { %v1451_v24 = vpop.f32.mrf.mxu1 }
 0x3c4   : > { %1556 = vst [vmem:[%s2713_s18 + $0x50] sm:$0xff] %v1460_v34  ;;  %v1452_v25 = vadd.f32 %v2710_v6, %v1451_v24 }
 0x3c5   : > { %v2036_v26 = vpop.f32.mrf.mxu1 }
 0x3c6   : > { %1554 = vst [vmem:[%s2713_s18 + $0x40] sm:$0xff] %v1452_v25  ;;  %v1463_v27 = vadd.f32 %v2036_v26, %v2710_v6 }
 0x3c7   : > { %v1454_v28 = vpop.f32.mrf.mxu1 }
 0x3c8   : > { %1557 = vst [vmem:[%s2713_s18 + $0x58] sm:$0xff] %v1463_v27  ;;  %v1455_v41 = vadd.f32 %v2710_v6, %v1454_v28 }
 0x3c9   : > { %v2039_v29 = vpop.f32.mrf.mxu1 }
 0x3ca   : > { %1555 = vst [vmem:[%s2713_s18 + $0x48] sm:$0xff] %v1455_v41  ;;  %v1476_v30 = vadd.f32 %v2039_v29, %v2710_v6 }
 0x3cb   : > { %v1467_v31 = vpop.f32.mrf.mxu1 }
 0x3cc   : > { %1560 = vst [vmem:[%s2713_s18 + $0x70] sm:$0xff] %v1476_v30  ;;  %v1468_v32 = vadd.f32 %v2710_v6, %v1467_v31 }
 0x3cd   : > { %v2040_v33 = vpop.f32.mrf.mxu1 }
 0x3ce   : > { %1558 = vst [vmem:[%s2713_s18 + $0x60] sm:$0xff] %v1468_v32  ;;  %v1479_v35 = vadd.f32 %v2040_v33, %v2710_v6 }
 0x3cf   : > { %v1470_v36 = vpop.f32.mrf.mxu1 }
 0x3d0   : > { %1561 = vst [vmem:[%s2713_s18 + $0x78] sm:$0xff] %v1479_v35  ;;  %v1471_v37 = vadd.f32 %v2710_v6, %v1470_v36 }
 0x3d1   : > { %v2043_v38 = vpop.f32.mrf.mxu1 }
 0x3d2   : > { %1559 = vst [vmem:[%s2713_s18 + $0x68] sm:$0xff] %v1471_v37  ;;  %v1492_v39 = vadd.f32 %v2043_v38, %v2710_v6 }
 0x3d3   : > { %v1483_v40 = vpop.f32.mrf.mxu1 }
 0x3d4   : > { %1564 = vst [vmem:[%s2713_s18 + $0x90] sm:$0xff] %v1492_v39  ;;  %v1484_v42 = vadd.f32 %v2710_v6, %v1483_v40 }
 0x3d5   : > { %v2044_v43 = vpop.f32.mrf.mxu1 }
 0x3d6   : > { %1562 = vst [vmem:[%s2713_s18 + $0x80] sm:$0xff] %v1484_v42  ;;  %v1495_v44 = vadd.f32 %v2044_v43, %v2710_v6 }
 0x3d7   : > { %v1486_v45 = vpop.f32.mrf.mxu1 }
 0x3d8   : > { %1565 = vst [vmem:[%s2713_s18 + $0x98] sm:$0xff] %v1495_v44  ;;  %v1487_v46 = vadd.f32 %v2710_v6, %v1486_v45 }
 0x3d9   : > { %v2047_v47 = vpop.f32.mrf.mxu1 }
 0x3da   : > { %1563 = vst [vmem:[%s2713_s18 + $0x88] sm:$0xff] %v1487_v46  ;;  %v1508_v48 = vadd.f32 %v2047_v47, %v2710_v6 }
 0x3db   : > { %v1499_v49 = vpop.f32.mrf.mxu1 }
 0x3dc   : > { %1568 = vst [vmem:[%s2713_s18 + $0xb0] sm:$0xff] %v1508_v48  ;;  %v1500_v50 = vadd.f32 %v2710_v6, %v1499_v49 }
 0x3dd   : > { %v2048_v51 = vpop.f32.mrf.mxu1 }
 0x3de   : > { %1566 = vst [vmem:[%s2713_s18 + $0xa0] sm:$0xff] %v1500_v50  ;;  %v1511_v52 = vadd.f32 %v2048_v51, %v2710_v6 }
 0x3df   : > { %v1502_v53 = vpop.f32.mrf.mxu1 }
 0x3e0   : > { %1569 = vst [vmem:[%s2713_s18 + $0xb8] sm:$0xff] %v1511_v52  ;;  %v1503_v54 = vadd.f32 %v2710_v6, %v1502_v53 }
 0x3e1   : > { %v2051_v55 = vpop.f32.mrf.mxu1 }
 0x3e2   : > { %1567 = vst [vmem:[%s2713_s18 + $0xa8] sm:$0xff] %v1503_v54  ;;  %v1524_v56 = vadd.f32 %v2051_v55, %v2710_v6 }
 0x3e3   : > { %v1515_v57 = vpop.f32.mrf.mxu1 }
 0x3e4   : > { %1572 = vst [vmem:[%s2713_s18 + $0xd0] sm:$0xff] %v1524_v56  ;;  %v1516_v58 = vadd.f32 %v2710_v6, %v1515_v57 }
 0x3e5   : > { %v2052_v59 = vpop.f32.mrf.mxu1 }
 0x3e6   : > { %1570 = vst [vmem:[%s2713_s18 + $0xc0] sm:$0xff] %v1516_v58  ;;  %v1527_v60 = vadd.f32 %v2052_v59, %v2710_v6 }
 0x3e7   : > { %v1518_v61 = vpop.f32.mrf.mxu1 }
 0x3e8   : > { %1573 = vst [vmem:[%s2713_s18 + $0xd8] sm:$0xff] %v1527_v60  ;;  %v1519_v62 = vadd.f32 %v2710_v6, %v1518_v61 }
 0x3e9   : > { %v2055_v63 = vpop.f32.mrf.mxu1 }
 0x3ea   : > { %1571 = vst [vmem:[%s2713_s18 + $0xc8] sm:$0xff] %v1519_v62  ;;  %v1540_v0 = vadd.f32 %v2055_v63, %v2710_v6 }
 0x3eb   : > { %v1531_v1 = vpop.f32.mrf.mxu1 }
 0x3ec   : > { %1576 = vst [vmem:[%s2713_s18 + $0xf0] sm:$0xff] %v1540_v0  ;;  %v1532_v2 = vadd.f32 %v2710_v6, %v1531_v1 }
 0x3ed   : > { %v2056_v3 = vpop.f32.mrf.mxu1 }
 0x3ee   : > { %1574 = vst [vmem:[%s2713_s18 + $0xe0] sm:$0xff] %v1532_v2  ;;  %v1543_v4 = vadd.f32 %v2056_v3, %v2710_v6 }
 0x3ef   : > { %v1534_v5 = vpop.f32.mrf.mxu1 }
 0x3f0   : > { %1577 = vst [vmem:[%s2713_s18 + $0xf8] sm:$0xff] %v1543_v4  ;;  %v1535_v7 = vadd.f32 %v2710_v6, %v1534_v5 }
 0x3f2   : > { %1575 = vst [vmem:[%s2713_s18 + $0xe8] sm:$0xff] %v1535_v7 }
 0x3f3   : > { %2305 = shalt.err (!%p2302_p5)
}
 0x3f4   : > { %s2306_s15 = scalar_lea.hbm %s2780_s30, 4096  ;;  %s2310_s22 = scalar_lea.hbm %s2834_s7, 16384 }
 0x3f5   : > { %p2307_p6 = scmp.ne.s32.totalorder %s2780_s30, %s2306_s15  ;;  %p2311_p0 = scmp.lt.s32.totalorder %s2780_s30, %s2834_s7 }
 0x3f6   : > { %p2312_p10 = scmp.lt.s32.totalorder %s2310_s22, %s2306_s15 }
 0x3f7   : > { %p2308_p4 = pnand %p2307_p6, %p2857_p1 }
 0x3f8   : > { %p2313_p3 = por %p2312_p10, %p2311_p0 }
 0x3f9   : > { %p2309_p8 = pneg %p2308_p4 }
 0x3fb   : > { %p2314_p7 = pnand %p2313_p3, %p2309_p8 }
 0x3fd   : > { %2317 = shalt.err (!%p2314_p7)
}
 0x3fe   : > { %s2373_s16 = smov 128   ;;  %s2374_s29 = smov 8  }
 0x3ff   : > { %2071 = dma.vmem_to_hbm [thread:$0]  (%p2857_p1), %s2782_s1, 4096, %s2780_s30, %s1579_s28, %s2373_s16, %s2373_s16, %s2374_s29  }
 0x400 PF: > { %p2098_p11 = scmp.ge.s32.totalorder %s2364_s27, 2  ;;  %s1607_s9 = sand.u32 1, %s2352_s24  }
 0x401   : > { %p2858_p9 = scmp.ne.s32.totalorder %s2843_s8, 0  ;;  %s1608_s10 = scalar_lea.sflag [#allocation4], %s1607_s9 }
 0x403   : > { %p2088_p12 = pnand %p2098_p11, %p2858_p9 }
 0x405   : > { %p2089_p13 = pneg %p2088_p12 }
 0x407   : > { %2347 = dma.done.wait (%p2089_p13), %s1608_s10, 4096  }
 0x408   : > { %2349 = vsyncadd (%p2089_p13), %s1608_s10, 4294963200  ;;  %p22_p2 = scmp.ge.s32.totalorder %s2503_s14, 6   ;;  %s2859_s24 = smov %s2356_s25 }
 0x409   : > { %s2860_s25 = smov %s2360_s26  ;;  %s2861_s26 = smov %s2513_s17 }
 0x40a   : > { %s2862_s27 = smov %s2503_s14  ;;  %24 = sbr.rel (!%p22_p2) target bundleno = 9 (0x9), region = 107 }
 0x40f   :  { %1613 = vsyncpa [#allocation3], 1 }
 0x410   :  { %1615 = vsyncpa [#allocation3 + $0x1], 1 }
 0x411   :  { %1616 = vsyncpa [#allocation6], 1 }
 0x412   :  { %1617 = vsyncpa [#allocation9], 1 }
 0x413   :  { %1618 = vsyncpa [#allocation4], 1 }
 0x414   :  { %1620 = vsyncpa [#allocation4 + $0x1], 1 }

</bundles_post_ra>
